<compile_context>
chip_gen: v6e
topology: v6e:2x2x1
jax: 0.10.0
libtpu: 0.0.40
codegen_flags: <defaults>
</compile_context>

<pallas_src>
import functools

import jax
import jax.numpy as jnp
from jax.experimental import pallas as pl
from jax.experimental.pallas import tpu as pltpu

BN_EPS = 1e-5
LANE = 128


# ----------------------------------------------------------------------------
# Fused kernel: whole generator forward in one body, everything in VMEM.
# ----------------------------------------------------------------------------
def _generator_fused_kernel(
    x_ref,
    w0_ref, b0_ref, g0_ref, be0_ref,
    w1_ref, b1_ref, g1_ref, be1_ref,
    w2_ref, b2_ref, g2_ref, be2_ref,
    w3_ref, b3_ref, g3_ref, be3_ref,
    w4_ref, b4_ref,
    o_ref,
):
    inv_n = 1.0 / x_ref.shape[0]

    def gen_block(x, w_ref, b_ref, g_ref, be_ref):
        # Linear
        y = jnp.dot(x, w_ref[...], preferred_element_type=jnp.float32) + b_ref[...]
        # BatchNorm1d, training mode: per-feature biased stats over the batch.
        mean = jnp.sum(y, axis=0, keepdims=True) * inv_n
        centered = y - mean
        var = jnp.sum(centered * centered, axis=0, keepdims=True) * inv_n
        # Fold gamma into the rsqrt scale: 1 mul + 1 add per element.
        scale = g_ref[...] * jax.lax.rsqrt(var + BN_EPS)
        # ReLU
        return jnp.maximum(centered * scale + be_ref[...], 0.0)

    x = x_ref[...]
    x = gen_block(x, w0_ref, b0_ref, g0_ref, be0_ref)
    x = gen_block(x, w1_ref, b1_ref, g1_ref, be1_ref)
    x = gen_block(x, w2_ref, b2_ref, g2_ref, be2_ref)
    x = gen_block(x, w3_ref, b3_ref, g3_ref, be3_ref)
    # Final Linear -> Sigmoid (lane-dense, padded output sliced in wrapper).
    y = jnp.dot(x, w4_ref[...], preferred_element_type=jnp.float32) + b4_ref[...]
    o_ref[...] = jax.nn.sigmoid(y)


# ----------------------------------------------------------------------------
# Padding helpers (done once at parameter-prep time, not per forward).
# ----------------------------------------------------------------------------
def _round_up(x, m):
    return ((x + m - 1) // m) * m


def _pad2(a, rows, cols, fill=0.0):
    r, c = a.shape
    if r == rows and c == cols:
        return a
    return jnp.pad(a, ((0, rows - r), (0, cols - c)), constant_values=fill)


def pad_generator_params(params):
    """Zero-pad every feature dim to a multiple of 128 (gamma padded with 1)."""
    padded = []
    for layer in params:
        w, b = layer[0], layer[1]
        d_in_p = _round_up(w.shape[0], LANE)
        d_out_p = _round_up(w.shape[1], LANE)
        wp = _pad2(w, d_in_p, d_out_p, fill=0.0)
        bp = _pad2(b, 1, d_out_p, fill=0.0)
        if len(layer) == 4:  # hidden block: also gamma / beta
            gp = _pad2(layer[2], 1, d_out_p, fill=1.0)
            bep = _pad2(layer[3], 1, d_out_p, fill=0.0)
            padded.append((wp, bp, gp, bep))
        else:
            padded.append((wp, bp))
    return padded


# ----------------------------------------------------------------------------
# Parameter construction + forward
# ----------------------------------------------------------------------------
def init_generator_params(key, z_dim, im_dim, hidden_dim):
    dims = [z_dim, hidden_dim, hidden_dim * 2, hidden_dim * 4, hidden_dim * 8, im_dim]
    params = []
    for i in range(len(dims) - 1):
        d_in, d_out = dims[i], dims[i + 1]
        key, kw, kb = jax.random.split(key, 3)
        bound = 1.0 / jnp.sqrt(d_in)
        w = jax.random.uniform(kw, (d_in, d_out), jnp.float32, -bound, bound)
        b = jax.random.uniform(kb, (1, d_out), jnp.float32, -bound, bound)
        if i < len(dims) - 2:  # hidden blocks carry BatchNorm affine params
            gamma = jnp.ones((1, d_out), jnp.float32)
            beta = jnp.zeros((1, d_out), jnp.float32)
            params.append((w, b, gamma, beta))
        else:
            params.append((w, b))
    return params


@functools.partial(jax.jit, static_argnames=("im_dim",))
def generator_forward(noise, padded_params, *, im_dim):
    n, z = noise.shape
    z_pad = padded_params[0][0].shape[0]
    d_out_pad = padded_params[-1][0].shape[1]
    noise_p = jnp.pad(noise, ((0, 0), (0, z_pad - z)))

    flat_inputs = [noise_p]
    for layer in padded_params:
        flat_inputs.extend(layer)

    vmem_spec = pl.BlockSpec(memory_space=pltpu.MemorySpace.VMEM)
    out_p = pl.pallas_call(
        _generator_fused_kernel,
        out_shape=jax.ShapeDtypeStruct((n, d_out_pad), jnp.float32),
        in_specs=[vmem_spec] * len(flat_inputs),
        out_specs=vmem_spec,
    )(*flat_inputs)
    # Drop the lane-padding columns; real outputs are the first im_dim columns.
    return out_p[:, :im_dim]


# Pure-JAX reference for sanity checking (same math, no Pallas, unpadded).
def generator_reference(noise, params):
    x = noise
    for w, b, gamma, beta in params[:-1]:
        y = x @ w + b
        mean = jnp.mean(y, axis=0, keepdims=True)
        var = jnp.mean((y - mean) ** 2, axis=0, keepdims=True)
        y = (y - mean) / jnp.sqrt(var + BN_EPS) * gamma + beta
        x = jnp.maximum(y, 0.0)
    w, b = params[-1]
    return jax.nn.sigmoid(x @ w + b)


if __name__ == "__main__":
    # Small shapes consistent with the module's forward: noise (batch, z_dim).
    batch = 8
    z_dim = 16
    hidden_dim = 32          # -> hidden widths 32, 64, 128, 256
    im_dim = 64

    key = jax.random.PRNGKey(0)
    key, knoise = jax.random.split(key)
    noise = jax.random.normal(knoise, (batch, z_dim), jnp.float32)

    params = init_generator_params(key, z_dim, im_dim, hidden_dim)
    padded_params = pad_generator_params(params)

    out = generator_forward(noise, padded_params, im_dim=im_dim)
    out = jax.block_until_ready(out)

    ref = generator_reference(noise, params)
    assert out.shape == (batch, im_dim)
    assert bool(jnp.all((out >= 0.0) & (out <= 1.0)))
    assert jnp.allclose(out, ref, atol=1e-5, rtol=1e-5)

    print("KERNEL_OK")
</pallas_src>

<mosaic_0001>
module attributes {stable_mosaic.version = 11 : i64} {
  func.func @_generator_fused_kernel(%arg0: memref<8x128xf32, #tpu.memory_space<vmem>>, %arg1: memref<128x128xf32, #tpu.memory_space<vmem>>, %arg2: memref<1x128xf32, #tpu.memory_space<vmem>>, %arg3: memref<1x128xf32, #tpu.memory_space<vmem>>, %arg4: memref<1x128xf32, #tpu.memory_space<vmem>>, %arg5: memref<128x128xf32, #tpu.memory_space<vmem>>, %arg6: memref<1x128xf32, #tpu.memory_space<vmem>>, %arg7: memref<1x128xf32, #tpu.memory_space<vmem>>, %arg8: memref<1x128xf32, #tpu.memory_space<vmem>>, %arg9: memref<128x128xf32, #tpu.memory_space<vmem>>, %arg10: memref<1x128xf32, #tpu.memory_space<vmem>>, %arg11: memref<1x128xf32, #tpu.memory_space<vmem>>, %arg12: memref<1x128xf32, #tpu.memory_space<vmem>>, %arg13: memref<128x256xf32, #tpu.memory_space<vmem>>, %arg14: memref<1x256xf32, #tpu.memory_space<vmem>>, %arg15: memref<1x256xf32, #tpu.memory_space<vmem>>, %arg16: memref<1x256xf32, #tpu.memory_space<vmem>>, %arg17: memref<256x128xf32, #tpu.memory_space<vmem>>, %arg18: memref<1x128xf32, #tpu.memory_space<vmem>>, %arg19: memref<8x128xf32, #tpu.memory_space<vmem>>) attributes {dimension_semantics = [], scalar_prefetch = 0 : i64, scratch_operands = 0 : i64, tpu.core_type = #tpu.core_type<tc>} {
    %c0 = arith.constant 0 : index
    %c0_0 = arith.constant 0 : index
    %0 = vector.load %arg0[%c0, %c0_0] : memref<8x128xf32, #tpu.memory_space<vmem>>, vector<8x128xf32>
    %c0_1 = arith.constant 0 : index
    %c0_2 = arith.constant 0 : index
    %1 = vector.load %arg1[%c0_1, %c0_2] : memref<128x128xf32, #tpu.memory_space<vmem>>, vector<128x128xf32>
    %cst = arith.constant dense<0.000000e+00> : vector<8x128xf32>
    %2 = tpu.matmul %0, %1, %cst {dimension_numbers = #tpu.dot_dimension_numbers<[1], [0], [0], [1], [0, 0, 1, 1], [], []>} : vector<8x128xf32>, vector<128x128xf32>, vector<8x128xf32> -> vector<8x128xf32>
    %c0_3 = arith.constant 0 : index
    %c0_4 = arith.constant 0 : index
    %3 = vector.load %arg2[%c0_3, %c0_4] : memref<1x128xf32, #tpu.memory_space<vmem>>, vector<1x128xf32>
    %4 = vector.broadcast %3 : vector<1x128xf32> to vector<8x128xf32>
    %5 = arith.addf %2, %4 : vector<8x128xf32>
    %cst_5 = arith.constant dense<0.000000e+00> : vector<128xf32>
    %6 = vector.multi_reduction <add>, %5, %cst_5 [0] : vector<8x128xf32> to vector<128xf32>
    %7 = vector.shape_cast %6 : vector<128xf32> to vector<1x128xf32>
    %cst_6 = arith.constant 1.250000e-01 : f32
    %8 = vector.broadcast %cst_6 : f32 to vector<1x128xf32>
    %9 = arith.mulf %7, %8 : vector<1x128xf32>
    %10 = vector.broadcast %9 : vector<1x128xf32> to vector<8x128xf32>
    %11 = arith.subf %5, %10 : vector<8x128xf32>
    %12 = arith.mulf %11, %11 : vector<8x128xf32>
    %cst_7 = arith.constant dense<0.000000e+00> : vector<128xf32>
    %13 = vector.multi_reduction <add>, %12, %cst_7 [0] : vector<8x128xf32> to vector<128xf32>
    %14 = vector.shape_cast %13 : vector<128xf32> to vector<1x128xf32>
    %cst_8 = arith.constant 1.250000e-01 : f32
    %15 = vector.broadcast %cst_8 : f32 to vector<1x128xf32>
    %16 = arith.mulf %14, %15 : vector<1x128xf32>
    %c0_9 = arith.constant 0 : index
    %c0_10 = arith.constant 0 : index
    %17 = vector.load %arg3[%c0_9, %c0_10] : memref<1x128xf32, #tpu.memory_space<vmem>>, vector<1x128xf32>
    %cst_11 = arith.constant 9.99999974E-6 : f32
    %18 = vector.broadcast %cst_11 : f32 to vector<1x128xf32>
    %19 = arith.addf %16, %18 : vector<1x128xf32>
    %20 = math.rsqrt %19 : vector<1x128xf32>
    %21 = arith.mulf %17, %20 : vector<1x128xf32>
    %22 = vector.broadcast %21 : vector<1x128xf32> to vector<8x128xf32>
    %23 = arith.mulf %11, %22 : vector<8x128xf32>
    %c0_12 = arith.constant 0 : index
    %c0_13 = arith.constant 0 : index
    %24 = vector.load %arg4[%c0_12, %c0_13] : memref<1x128xf32, #tpu.memory_space<vmem>>, vector<1x128xf32>
    %25 = vector.broadcast %24 : vector<1x128xf32> to vector<8x128xf32>
    %26 = arith.addf %23, %25 : vector<8x128xf32>
    %cst_14 = arith.constant 0.000000e+00 : f32
    %27 = vector.broadcast %cst_14 : f32 to vector<8x128xf32>
    %28 = arith.maximumf %26, %27 : vector<8x128xf32>
    %c0_15 = arith.constant 0 : index
    %c0_16 = arith.constant 0 : index
    %29 = vector.load %arg5[%c0_15, %c0_16] : memref<128x128xf32, #tpu.memory_space<vmem>>, vector<128x128xf32>
    %cst_17 = arith.constant dense<0.000000e+00> : vector<8x128xf32>
    %30 = tpu.matmul %28, %29, %cst_17 {dimension_numbers = #tpu.dot_dimension_numbers<[1], [0], [0], [1], [0, 0, 1, 1], [], []>} : vector<8x128xf32>, vector<128x128xf32>, vector<8x128xf32> -> vector<8x128xf32>
    %c0_18 = arith.constant 0 : index
    %c0_19 = arith.constant 0 : index
    %31 = vector.load %arg6[%c0_18, %c0_19] : memref<1x128xf32, #tpu.memory_space<vmem>>, vector<1x128xf32>
    %32 = vector.broadcast %31 : vector<1x128xf32> to vector<8x128xf32>
    %33 = arith.addf %30, %32 : vector<8x128xf32>
    %cst_20 = arith.constant dense<0.000000e+00> : vector<128xf32>
    %34 = vector.multi_reduction <add>, %33, %cst_20 [0] : vector<8x128xf32> to vector<128xf32>
    %35 = vector.shape_cast %34 : vector<128xf32> to vector<1x128xf32>
    %cst_21 = arith.constant 1.250000e-01 : f32
    %36 = vector.broadcast %cst_21 : f32 to vector<1x128xf32>
    %37 = arith.mulf %35, %36 : vector<1x128xf32>
    %38 = vector.broadcast %37 : vector<1x128xf32> to vector<8x128xf32>
    %39 = arith.subf %33, %38 : vector<8x128xf32>
    %40 = arith.mulf %39, %39 : vector<8x128xf32>
    %cst_22 = arith.constant dense<0.000000e+00> : vector<128xf32>
    %41 = vector.multi_reduction <add>, %40, %cst_22 [0] : vector<8x128xf32> to vector<128xf32>
    %42 = vector.shape_cast %41 : vector<128xf32> to vector<1x128xf32>
    %cst_23 = arith.constant 1.250000e-01 : f32
    %43 = vector.broadcast %cst_23 : f32 to vector<1x128xf32>
    %44 = arith.mulf %42, %43 : vector<1x128xf32>
    %c0_24 = arith.constant 0 : index
    %c0_25 = arith.constant 0 : index
    %45 = vector.load %arg7[%c0_24, %c0_25] : memref<1x128xf32, #tpu.memory_space<vmem>>, vector<1x128xf32>
    %cst_26 = arith.constant 9.99999974E-6 : f32
    %46 = vector.broadcast %cst_26 : f32 to vector<1x128xf32>
    %47 = arith.addf %44, %46 : vector<1x128xf32>
    %48 = math.rsqrt %47 : vector<1x128xf32>
    %49 = arith.mulf %45, %48 : vector<1x128xf32>
    %50 = vector.broadcast %49 : vector<1x128xf32> to vector<8x128xf32>
    %51 = arith.mulf %39, %50 : vector<8x128xf32>
    %c0_27 = arith.constant 0 : index
    %c0_28 = arith.constant 0 : index
    %52 = vector.load %arg8[%c0_27, %c0_28] : memref<1x128xf32, #tpu.memory_space<vmem>>, vector<1x128xf32>
    %53 = vector.broadcast %52 : vector<1x128xf32> to vector<8x128xf32>
    %54 = arith.addf %51, %53 : vector<8x128xf32>
    %cst_29 = arith.constant 0.000000e+00 : f32
    %55 = vector.broadcast %cst_29 : f32 to vector<8x128xf32>
    %56 = arith.maximumf %54, %55 : vector<8x128xf32>
    %c0_30 = arith.constant 0 : index
    %c0_31 = arith.constant 0 : index
    %57 = vector.load %arg9[%c0_30, %c0_31] : memref<128x128xf32, #tpu.memory_space<vmem>>, vector<128x128xf32>
    %cst_32 = arith.constant dense<0.000000e+00> : vector<8x128xf32>
    %58 = tpu.matmul %56, %57, %cst_32 {dimension_numbers = #tpu.dot_dimension_numbers<[1], [0], [0], [1], [0, 0, 1, 1], [], []>} : vector<8x128xf32>, vector<128x128xf32>, vector<8x128xf32> -> vector<8x128xf32>
    %c0_33 = arith.constant 0 : index
    %c0_34 = arith.constant 0 : index
    %59 = vector.load %arg10[%c0_33, %c0_34] : memref<1x128xf32, #tpu.memory_space<vmem>>, vector<1x128xf32>
    %60 = vector.broadcast %59 : vector<1x128xf32> to vector<8x128xf32>
    %61 = arith.addf %58, %60 : vector<8x128xf32>
    %cst_35 = arith.constant dense<0.000000e+00> : vector<128xf32>
    %62 = vector.multi_reduction <add>, %61, %cst_35 [0] : vector<8x128xf32> to vector<128xf32>
    %63 = vector.shape_cast %62 : vector<128xf32> to vector<1x128xf32>
    %cst_36 = arith.constant 1.250000e-01 : f32
    %64 = vector.broadcast %cst_36 : f32 to vector<1x128xf32>
    %65 = arith.mulf %63, %64 : vector<1x128xf32>
    %66 = vector.broadcast %65 : vector<1x128xf32> to vector<8x128xf32>
    %67 = arith.subf %61, %66 : vector<8x128xf32>
    %68 = arith.mulf %67, %67 : vector<8x128xf32>
    %cst_37 = arith.constant dense<0.000000e+00> : vector<128xf32>
    %69 = vector.multi_reduction <add>, %68, %cst_37 [0] : vector<8x128xf32> to vector<128xf32>
    %70 = vector.shape_cast %69 : vector<128xf32> to vector<1x128xf32>
    %cst_38 = arith.constant 1.250000e-01 : f32
    %71 = vector.broadcast %cst_38 : f32 to vector<1x128xf32>
    %72 = arith.mulf %70, %71 : vector<1x128xf32>
    %c0_39 = arith.constant 0 : index
    %c0_40 = arith.constant 0 : index
    %73 = vector.load %arg11[%c0_39, %c0_40] : memref<1x128xf32, #tpu.memory_space<vmem>>, vector<1x128xf32>
    %cst_41 = arith.constant 9.99999974E-6 : f32
    %74 = vector.broadcast %cst_41 : f32 to vector<1x128xf32>
    %75 = arith.addf %72, %74 : vector<1x128xf32>
    %76 = math.rsqrt %75 : vector<1x128xf32>
    %77 = arith.mulf %73, %76 : vector<1x128xf32>
    %78 = vector.broadcast %77 : vector<1x128xf32> to vector<8x128xf32>
    %79 = arith.mulf %67, %78 : vector<8x128xf32>
    %c0_42 = arith.constant 0 : index
    %c0_43 = arith.constant 0 : index
    %80 = vector.load %arg12[%c0_42, %c0_43] : memref<1x128xf32, #tpu.memory_space<vmem>>, vector<1x128xf32>
    %81 = vector.broadcast %80 : vector<1x128xf32> to vector<8x128xf32>
    %82 = arith.addf %79, %81 : vector<8x128xf32>
    %cst_44 = arith.constant 0.000000e+00 : f32
    %83 = vector.broadcast %cst_44 : f32 to vector<8x128xf32>
    %84 = arith.maximumf %82, %83 : vector<8x128xf32>
    %c0_45 = arith.constant 0 : index
    %c0_46 = arith.constant 0 : index
    %85 = vector.load %arg13[%c0_45, %c0_46] : memref<128x256xf32, #tpu.memory_space<vmem>>, vector<128x256xf32>
    %cst_47 = arith.constant dense<0.000000e+00> : vector<8x256xf32>
    %86 = tpu.matmul %84, %85, %cst_47 {dimension_numbers = #tpu.dot_dimension_numbers<[1], [0], [0], [1], [0, 0, 1, 1], [], []>} : vector<8x128xf32>, vector<128x256xf32>, vector<8x256xf32> -> vector<8x256xf32>
    %c0_48 = arith.constant 0 : index
    %c0_49 = arith.constant 0 : index
    %87 = vector.load %arg14[%c0_48, %c0_49] : memref<1x256xf32, #tpu.memory_space<vmem>>, vector<1x256xf32>
    %88 = vector.broadcast %87 : vector<1x256xf32> to vector<8x256xf32>
    %89 = arith.addf %86, %88 : vector<8x256xf32>
    %cst_50 = arith.constant dense<0.000000e+00> : vector<256xf32>
    %90 = vector.multi_reduction <add>, %89, %cst_50 [0] : vector<8x256xf32> to vector<256xf32>
    %91 = vector.shape_cast %90 : vector<256xf32> to vector<1x256xf32>
    %cst_51 = arith.constant 1.250000e-01 : f32
    %92 = vector.broadcast %cst_51 : f32 to vector<1x256xf32>
    %93 = arith.mulf %91, %92 : vector<1x256xf32>
    %94 = vector.broadcast %93 : vector<1x256xf32> to vector<8x256xf32>
    %95 = arith.subf %89, %94 : vector<8x256xf32>
    %96 = arith.mulf %95, %95 : vector<8x256xf32>
    %cst_52 = arith.constant dense<0.000000e+00> : vector<256xf32>
    %97 = vector.multi_reduction <add>, %96, %cst_52 [0] : vector<8x256xf32> to vector<256xf32>
    %98 = vector.shape_cast %97 : vector<256xf32> to vector<1x256xf32>
    %cst_53 = arith.constant 1.250000e-01 : f32
    %99 = vector.broadcast %cst_53 : f32 to vector<1x256xf32>
    %100 = arith.mulf %98, %99 : vector<1x256xf32>
    %c0_54 = arith.constant 0 : index
    %c0_55 = arith.constant 0 : index
    %101 = vector.load %arg15[%c0_54, %c0_55] : memref<1x256xf32, #tpu.memory_space<vmem>>, vector<1x256xf32>
    %cst_56 = arith.constant 9.99999974E-6 : f32
    %102 = vector.broadcast %cst_56 : f32 to vector<1x256xf32>
    %103 = arith.addf %100, %102 : vector<1x256xf32>
    %104 = math.rsqrt %103 : vector<1x256xf32>
    %105 = arith.mulf %101, %104 : vector<1x256xf32>
    %106 = vector.broadcast %105 : vector<1x256xf32> to vector<8x256xf32>
    %107 = arith.mulf %95, %106 : vector<8x256xf32>
    %c0_57 = arith.constant 0 : index
    %c0_58 = arith.constant 0 : index
    %108 = vector.load %arg16[%c0_57, %c0_58] : memref<1x256xf32, #tpu.memory_space<vmem>>, vector<1x256xf32>
    %109 = vector.broadcast %108 : vector<1x256xf32> to vector<8x256xf32>
    %110 = arith.addf %107, %109 : vector<8x256xf32>
    %cst_59 = arith.constant 0.000000e+00 : f32
    %111 = vector.broadcast %cst_59 : f32 to vector<8x256xf32>
    %112 = arith.maximumf %110, %111 : vector<8x256xf32>
    %c0_60 = arith.constant 0 : index
    %c0_61 = arith.constant 0 : index
    %113 = vector.load %arg17[%c0_60, %c0_61] : memref<256x128xf32, #tpu.memory_space<vmem>>, vector<256x128xf32>
    %cst_62 = arith.constant dense<0.000000e+00> : vector<8x128xf32>
    %114 = tpu.matmul %112, %113, %cst_62 {dimension_numbers = #tpu.dot_dimension_numbers<[1], [0], [0], [1], [0, 0, 1, 1], [], []>} : vector<8x256xf32>, vector<256x128xf32>, vector<8x128xf32> -> vector<8x128xf32>
    %c0_63 = arith.constant 0 : index
    %c0_64 = arith.constant 0 : index
    %115 = vector.load %arg18[%c0_63, %c0_64] : memref<1x128xf32, #tpu.memory_space<vmem>>, vector<1x128xf32>
    %116 = vector.broadcast %115 : vector<1x128xf32> to vector<8x128xf32>
    %117 = arith.addf %114, %116 : vector<8x128xf32>
    %118 = arith.negf %117 : vector<8x128xf32>
    %119 = math.exp %118 : vector<8x128xf32>
    %cst_65 = arith.constant 1.000000e+00 : f32
    %120 = vector.broadcast %cst_65 : f32 to vector<8x128xf32>
    %121 = arith.addf %120, %119 : vector<8x128xf32>
    %122 = arith.divf %120, %121 : vector<8x128xf32>
    %c0_66 = arith.constant 0 : index
    %c0_67 = arith.constant 0 : index
    %123 = vector.load %arg19[%c0_66, %c0_67] : memref<8x128xf32, #tpu.memory_space<vmem>>, vector<8x128xf32>
    tpu.vector_store %arg19[%c0_66, %c0_67], %122 {strides = array<i32>} : memref<8x128xf32, #tpu.memory_space<vmem>>, vector<8x128xf32>,
    return
  }
}

</mosaic_0001>

<bundles_post_ra>
// kernel: generator_forward.1
= control target key start
LH: loop header
LB: loop body
LE: loop exit
PB: predicated region body
PF: predicated region fallthrough
CT: control target
= control target key end

     0   :  { %s1459_s0 = inlined_call_operand.vmem [shape: f32[8,128], index: 0, kind: input, shape index: {}]   ;;  %s1460_s1 = inlined_call_operand.hbm [shape: f32[128,128], index: 1, kind: input, shape index: {}]   ;;  %s1461_s2 = inlined_call_operand.vmem [shape: f32[1,128], index: 2, kind: input, shape index: {}]   ;;  %s1462_s3 = inlined_call_operand.vmem [shape: f32[1,128], index: 3, kind: input, shape index: {}]   ;;  %s1463_s4 = inlined_call_operand.vmem [shape: f32[1,128], index: 4, kind: input, shape index: {}]   ;;  %s1464_s5 = inlined_call_operand.hbm [shape: f32[128,128], index: 5, kind: input, shape index: {}]   ;;  %s1465_s6 = inlined_call_operand.vmem [shape: f32[1,128], index: 6, kind: input, shape index: {}]   ;;  %s1466_s7 = inlined_call_operand.vmem [shape: f32[1,128], index: 7, kind: input, shape index: {}]   ;;  %s1467_s8 = inlined_call_operand.vmem [shape: f32[1,128], index: 8, kind: input, shape index: {}]   ;;  %s1468_s9 = inlined_call_operand.hbm [shape: f32[128,128], index: 9, kind: input, shape index: {}]   ;;  %s1469_s10 = inlined_call_operand.vmem [shape: f32[1,128], index: 10, kind: input, shape index: {}]   ;;  %s1470_s11 = inlined_call_operand.vmem [shape: f32[1,128], index: 11, kind: input, shape index: {}]   ;;  %s1471_s12 = inlined_call_operand.vmem [shape: f32[1,128], index: 12, kind: input, shape index: {}]   ;;  %s1472_s13 = inlined_call_operand.hbm [shape: f32[128,256], index: 13, kind: input, shape index: {}]   ;;  %s1473_s14 = inlined_call_operand.vmem [shape: f32[1,256], index: 14, kind: input, shape index: {}]   ;;  %s1474_s15 = inlined_call_operand.vmem [shape: f32[1,256], index: 15, kind: input, shape index: {}]   ;;  %s1475_s16 = inlined_call_operand.vmem [shape: f32[1,256], index: 16, kind: input, shape index: {}]   ;;  %s1476_s17 = inlined_call_operand.hbm [shape: f32[256,128], index: 17, kind: input, shape index: {}]   ;;  %s1477_s18 = inlined_call_operand.vmem [shape: f32[1,128], index: 18, kind: input, shape index: {}]   ;;  %s1478_s19 = inlined_call_operand.hbm [shape: f32[8,128], index: 19, kind: output, shape index: {}]  }
   0x1   :  { %1479 = sst [smem:[#allocation16_spill]] %s1459_s0 }
   0x2   :  { %1480 = sst [smem:[#allocation17_spill]] %s1460_s1 }
   0x3   :  { %1481 = sst [smem:[#allocation18_spill]] %s1461_s2 }
   0x4   :  { %1482 = sst [smem:[#allocation19_spill]] %s1462_s3 }
   0x5   :  { %24 = vsyncpa [#allocation3], 0 }
   0x6   :  { %25 = vsyncpa [#allocation6], 0 }
   0x7   :  { %26 = vsyncpa [#allocation9], 0 }
   0x8   :  { %27 = vsyncpa [#allocation4], 0  ;;  %s1206_s0 = smov [#allocation5]   ;;  %s1207_s20 = smov [#allocation8]  }
   0x9   :  { %s53_s30 = sshll.u32 %s1206_s0, 4  ;;  %s89_s21 = sshll.u32 %s1207_s20, 4  ;;  %s54_s30 = int_to_ptr.vmem [resolvable:$true] %s53_s30  ;;  %s90_s21 = int_to_ptr.vmem [resolvable:$true] %s89_s21 }
   0xa   :  { %s1086_s1 = scalar_lea.vmem %s54_s30, 2048  ;;  %p1091_p1 = scmp.lt.s32.totalorder %s54_s30, %s54_s30 }
   0xb   :  { %p1087_p0 = scmp.ne.s32.totalorder %s54_s30, %s1086_s1  ;;  %p1092_p2 = scmp.lt.s32.totalorder %s1086_s1, %s1086_s1 }
   0xd   :  { %p1093_p3 = por %p1092_p2, %p1091_p1 }
   0xf   :  { %p1094_p4 = pnand %p1093_p3, %p1087_p0 }
  0x11   :  { %1097 = shalt.err (!%p1094_p4)
}
  0x12   :  { %s1208_s22 = smov 128   ;;  %s1209_s2 = smov 8  }
  0x13   :  { %59 = dma.hbm_to_vmem [thread:$0]  %s1464_s5, 2048, %s54_s30, [#allocation6], %s1208_s22, %s1208_s22, %s1209_s2  }
  0x14   :  { %s1106_s25 = scalar_lea.vmem %s90_s21, 4096  ;;  %p1111_p6 = scmp.lt.s32.totalorder %s90_s21, %s90_s21 }
  0x15   :  { %p1107_p5 = scmp.ne.s32.totalorder %s90_s21, %s1106_s25  ;;  %p1112_p7 = scmp.lt.s32.totalorder %s1106_s25, %s1106_s25 }
  0x17   :  { %p1113_p8 = por %p1112_p7, %p1111_p6 }
  0x19   :  { %p1114_p9 = pnand %p1113_p8, %p1107_p5 }
  0x1b   :  { %1117 = shalt.err (!%p1114_p9)
}
  0x1c   :  { %s1210_s3 = smov 256   ;;  %s1211_s26 = smov 16  }
  0x1d   :  { %95 = dma.hbm_to_vmem [thread:$0]  %s1472_s13, 4096, %s90_s21, [#allocation9], %s1210_s3, %s1210_s3, %s1211_s26  }
  0x1e   :  { %s1212_s29 = smov [#allocation2]   ;;  %s1213_s20 = smov [#allocation7]  }
  0x1f   :  { %s35_s0 = sshll.u32 %s1212_s29, 4  ;;  %s71_s1 = sshll.u32 %s1213_s20, 4  ;;  %s36_s0 = int_to_ptr.vmem [resolvable:$true] %s35_s0  ;;  %s72_s1 = int_to_ptr.vmem [resolvable:$true] %s71_s1 }
  0x20   :  { %s1126_s5 = scalar_lea.vmem %s36_s0, 2048  ;;  %p1131_p11 = scmp.lt.s32.totalorder %s36_s0, %s36_s0 }
  0x21   :  { %p1127_p10 = scmp.ne.s32.totalorder %s36_s0, %s1126_s5  ;;  %p1132_p12 = scmp.lt.s32.totalorder %s1126_s5, %s1126_s5 }
  0x23   :  { %p1133_p13 = por %p1132_p12, %p1131_p11 }
  0x25   :  { %p1134_p0 = pnand %p1133_p13, %p1127_p10 }
  0x27   :  { %1137 = shalt.err (!%p1134_p0)
}
  0x28   :  { %s1483_s24 = sld [smem:[#allocation17_spill]]  ;;  %s1146_s13 = scalar_lea.vmem %s72_s1, 2048 }
  0x29   :  { %p1147_p1 = scmp.ne.s32.totalorder %s72_s1, %s1146_s13  ;;  %p1151_p2 = scmp.lt.s32.totalorder %s72_s1, %s72_s1 }
  0x2a   :  { %p1152_p3 = scmp.lt.s32.totalorder %s1146_s13, %s1146_s13 }
  0x2c   :  { %p1153_p4 = por %p1152_p3, %p1151_p2 }
  0x2e   :  { %41 = dma.hbm_to_vmem [thread:$0]  %s1483_s24, 2048, %s36_s0, [#allocation3], %s1208_s22, %s1208_s22, %s1209_s2  }
  0x2f   :  { %p1154_p5 = pnand %p1153_p4, %p1147_p1 }
  0x31   :  { %1157 = shalt.err (!%p1154_p5)
}
  0x32   :  { %77 = dma.hbm_to_vmem [thread:$0]  %s1468_s9, 2048, %s72_s1, [#allocation6], %s1208_s22, %s1208_s22, %s1209_s2  }
  0x33   :  { %s1214_s3 = smov [#allocation10]  }
  0x34   :  { %s107_s26 = sshll.u32 %s1214_s3, 4  ;;  %s108_s26 = int_to_ptr.vmem [resolvable:$true] %s107_s26 }
  0x35   :  { %s1166_s27 = scalar_lea.vmem %s108_s26, 4096  ;;  %p1171_p7 = scmp.lt.s32.totalorder %s108_s26, %s108_s26 }
  0x36   :  { %p1167_p6 = scmp.ne.s32.totalorder %s108_s26, %s1166_s27  ;;  %p1172_p8 = scmp.lt.s32.totalorder %s1166_s27, %s1166_s27 }
  0x38   :  { %p1173_p9 = por %p1172_p8, %p1171_p7 }
  0x3a   :  { %p1174_p10 = pnand %p1173_p9, %p1167_p6 }
  0x3c   :  { %1177 = shalt.err (!%p1174_p10)
}
  0x3d   :  { %113 = dma.hbm_to_vmem [thread:$0]  %s1476_s17, 4096, %s108_s26, [#allocation9], %s1208_s22, %s1208_s22, %s1209_s2  }
  0x3e   :  { %1198 = dma.done.wait [#allocation3], 2048  }
  0x3f   :  { %1199 = vsyncadd [#allocation3], 4294965248 }
  0x40   :  { %1200 = dma.done.wait [#allocation6], 4096  }
  0x41   :  { %1201 = vsyncadd [#allocation6], 4294963200 }
  0x42   :  { %1202 = dma.done.wait [#allocation9], 8192  }
  0x43   :  { %1203 = vsyncadd [#allocation9], 4294959104  ;;  %v1215_v0 = vmov 0.0   ;;  %vm1216_vm0 = vmmov 0   ;;  %v147_v1 = vld [vmem:[#allocation2 + $0x78] sm:$0xff]  ;;  %v146_v2 = vld [vmem:[#allocation2 + $0x70] sm:$0xff]  ;;  %v246_v55 = vlaneseq }
  0x44   :  { %946 = vmatprep.subr.mxu0 %v1215_v0  ;;  %978 = vmatprep.mubr.msk.f32.mxu0 %vm1216_vm0, %v1215_v0  ;;  %v145_v3 = vld [vmem:[#allocation2 + $0x68] sm:$0xff]  ;;  %v144_v4 = vld [vmem:[#allocation2 + $0x60] sm:$0xff]  ;;  %v143_v5 = vld [vmem:[#allocation2 + $0x58] sm:$0xff]  ;;  %s1484_s22 = sld [smem:[#allocation16_spill]] }
  0x45   :  { %981 = vmatprep.subr.mxu1 %v1215_v0  ;;  %1013 = vmatprep.mubr.msk.f32.mxu1 %vm1216_vm0, %v1215_v0  ;;  %v142_v6 = vld [vmem:[#allocation2 + $0x50] sm:$0xff]  ;;  %v141_v7 = vld [vmem:[#allocation2 + $0x48] sm:$0xff]  ;;  %v140_v8 = vld [vmem:[#allocation2 + $0x40] sm:$0xff]  ;;  %s1485_s20 = sld [smem:[#allocation18_spill]]  ;;  %v1391_v56 = vshrl.u32 %v246_v55, 7 }
  0x46   :  { %947 = vmatpush3.msra.mxu0 %v147_v1  ;;  %v139_v9 = vld [vmem:[#allocation2 + $0x38] sm:$0xff]  ;;  %v138_v10 = vld [vmem:[#allocation2 + $0x30] sm:$0xff]  ;;  %v137_v11 = vld [vmem:[#allocation2 + $0x28] sm:$0xff]  ;;  %s1486_s30 = sld [smem:[#allocation19_spill]] }
  0x47   :  { %948 = vmatprep.subr.mxu0 %v1215_v0  ;;  %v136_v12 = vld [vmem:[#allocation2 + $0x20] sm:$0xff]  ;;  %v135_v13 = vld [vmem:[#allocation2 + $0x18] sm:$0xff]  ;;  %v134_v14 = vld [vmem:[#allocation2 + $0x10] sm:$0xff]  ;;  %v1397_v58 = vsub.s32 0, %v1391_v56 }
  0x48   :  { %949 = vmatpush3.msra.mxu0 %v146_v2  ;;  %v133_v15 = vld [vmem:[#allocation2 + $0x8] sm:$0xff]  ;;  %v132_v16 = vld [vmem:[#allocation2] sm:$0xff]  ;;  %v276_v18 = vld [vmem:[#allocation5 + $0x78] sm:$0xff] }
  0x49   :  { %950 = vmatprep.subr.mxu0 %v1215_v0  ;;  %982 = vmatpush3.msra.mxu1 %v276_v18  ;;  %v275_v19 = vld [vmem:[#allocation5 + $0x70] sm:$0xff]  ;;  %v274_v20 = vld [vmem:[#allocation5 + $0x68] sm:$0xff]  ;;  %v273_v21 = vld [vmem:[#allocation5 + $0x60] sm:$0xff] }
  0x4a   :  { %951 = vmatpush3.msra.mxu0 %v145_v3  ;;  %v131_v17 = vld [vmem:[%s1484_s22] sm:$0xff]  ;;  %983 = vmatprep.subr.mxu1 %v1215_v0  ;;  %v272_v22 = vld [vmem:[#allocation5 + $0x58] sm:$0xff]  ;;  %v271_v23 = vld [vmem:[#allocation5 + $0x50] sm:$0xff] }
  0x4b   :  { %952 = vmatprep.subr.mxu0 %v1215_v0  ;;  %984 = vmatpush3.msra.mxu1 %v275_v19  ;;  %v270_v24 = vld [vmem:[#allocation5 + $0x48] sm:$0xff]  ;;  %v269_v25 = vld [vmem:[#allocation5 + $0x40] sm:$0xff]  ;;  %v268_v26 = vld [vmem:[#allocation5 + $0x38] sm:$0xff] }
  0x4c   :  { %953 = vmatpush3.msra.mxu0 %v144_v4  ;;  %985 = vmatprep.subr.mxu1 %v1215_v0  ;;  %v267_v27 = vld [vmem:[#allocation5 + $0x30] sm:$0xff]  ;;  %v266_v28 = vld [vmem:[#allocation5 + $0x28] sm:$0xff]  ;;  %v265_v29 = vld [vmem:[#allocation5 + $0x20] sm:$0xff] }
  0x4d   :  { %954 = vmatprep.subr.mxu0 %v1215_v0  ;;  %986 = vmatpush3.msra.mxu1 %v274_v20  ;;  %v264_v30 = vld [vmem:[#allocation5 + $0x18] sm:$0xff]  ;;  %v263_v31 = vld [vmem:[#allocation5 + $0x10] sm:$0xff]  ;;  %v262_v32 = vld [vmem:[#allocation5 + $0x8] sm:$0xff] }
  0x4e   :  { %955 = vmatpush3.msra.mxu0 %v143_v5  ;;  %987 = vmatprep.subr.mxu1 %v1215_v0  ;;  %v261_v33 = vld [vmem:[#allocation5] sm:$0xff]  ;;  %v405_v3 = vld [vmem:[#allocation7 + $0x78] sm:$0xff]  ;;  %v404_v4 = vld [vmem:[#allocation7 + $0x70] sm:$0xff] }
  0x4f   :  { %956 = vmatprep.subr.mxu0 %v1215_v0  ;;  %988 = vmatpush3.msra.mxu1 %v273_v21  ;;  %v852_v34 = vld [vmem:[%s1485_s20] ss:$0 sm:$0xff]  ;;  %v403_v5 = vld [vmem:[#allocation7 + $0x68] sm:$0xff]  ;;  %v542_v55 = vld [vmem:[#allocation8 + $0xb8] sm:$0xff] }
  0x50   :  { %957 = vmatpush3.msra.mxu0 %v142_v6  ;;  %989 = vmatprep.subr.mxu1 %v1215_v0  ;;  %v241_v57 = vld [vmem:[%s1486_s30] sm:$0x1] }
  0x51   :  { %958 = vmatprep.subr.mxu0 %v1215_v0  ;;  %990 = vmatpush3.msra.mxu1 %v272_v22  ;;  %v853_v62 = vld [vmem:[%s1463_s4] ss:$0 sm:$0xff] }
  0x52   :  { %959 = vmatpush3.msra.mxu0 %v141_v7  ;;  %991 = vmatprep.subr.mxu1 %v1215_v0  ;;  %v402_v6 = vld [vmem:[#allocation7 + $0x60] sm:$0xff]  ;;  %v401_v7 = vld [vmem:[#allocation7 + $0x58] sm:$0xff] }
  0x53   :  { %960 = vmatprep.subr.mxu0 %v1215_v0  ;;  %992 = vmatpush3.msra.mxu1 %v271_v23  ;;  %v390_v18 = vld [vmem:[#allocation7] sm:$0xff] }
  0x54   :  { %961 = vmatpush3.msra.mxu0 %v140_v8  ;;  %993 = vmatprep.subr.mxu1 %v1215_v0  ;;  %v400_v8 = vld [vmem:[#allocation7 + $0x50] sm:$0xff]  ;;  %v854_v19 = vld [vmem:[%s1465_s6] ss:$0 sm:$0xff] }
  0x55   :  { %962 = vmatprep.subr.mxu0 %v1215_v0  ;;  %994 = vmatpush3.msra.mxu1 %v270_v24 }
  0x56   :  { %963 = vmatpush3.msra.mxu0 %v139_v9  ;;  %995 = vmatprep.subr.mxu1 %v1215_v0  ;;  %v399_v9 = vld [vmem:[#allocation7 + $0x48] sm:$0xff] }
  0x57   :  { %964 = vmatprep.subr.mxu0 %v1215_v0  ;;  %996 = vmatpush3.msra.mxu1 %v269_v25 }
  0x58   :  { %965 = vmatpush3.msra.mxu0 %v138_v10  ;;  %997 = vmatprep.subr.mxu1 %v1215_v0  ;;  %v398_v10 = vld [vmem:[#allocation7 + $0x40] sm:$0xff] }
  0x59   :  { %966 = vmatprep.subr.mxu0 %v1215_v0  ;;  %998 = vmatpush3.msra.mxu1 %v268_v26 }
  0x5a   :  { %967 = vmatpush3.msra.mxu0 %v137_v11  ;;  %999 = vmatprep.subr.mxu1 %v1215_v0  ;;  %v397_v11 = vld [vmem:[#allocation7 + $0x38] sm:$0xff] }
  0x5b   :  { %968 = vmatprep.subr.mxu0 %v1215_v0  ;;  %1000 = vmatpush3.msra.mxu1 %v267_v27 }
  0x5c   :  { %969 = vmatpush3.msra.mxu0 %v136_v12  ;;  %1001 = vmatprep.subr.mxu1 %v1215_v0  ;;  %v396_v12 = vld [vmem:[#allocation7 + $0x30] sm:$0xff] }
  0x5d   :  { %970 = vmatprep.subr.mxu0 %v1215_v0  ;;  %1002 = vmatpush3.msra.mxu1 %v266_v28 }
  0x5e   :  { %971 = vmatpush3.msra.mxu0 %v135_v13  ;;  %1003 = vmatprep.subr.mxu1 %v1215_v0  ;;  %v395_v13 = vld [vmem:[#allocation7 + $0x28] sm:$0xff] }
  0x5f   :  { %972 = vmatprep.subr.mxu0 %v1215_v0  ;;  %1004 = vmatpush3.msra.mxu1 %v265_v29 }
  0x60   :  { %973 = vmatpush3.msra.mxu0 %v134_v14  ;;  %1005 = vmatprep.subr.mxu1 %v1215_v0  ;;  %v394_v14 = vld [vmem:[#allocation7 + $0x20] sm:$0xff] }
  0x61   :  { %974 = vmatprep.subr.mxu0 %v1215_v0  ;;  %1006 = vmatpush3.msra.mxu1 %v264_v30 }
  0x62   :  { %975 = vmatpush3.msra.mxu0 %v133_v15  ;;  %1007 = vmatprep.subr.mxu1 %v1215_v0  ;;  %v393_v15 = vld [vmem:[#allocation7 + $0x18] sm:$0xff] }
  0x63   :  { %976 = vmatprep.subr.mxu0 %v1215_v0  ;;  %1008 = vmatpush3.msra.mxu1 %v263_v31 }
  0x64   :  { %977 = vmatpush3.msra.mxu0 %v132_v16  ;;  %1009 = vmatprep.subr.mxu1 %v1215_v0  ;;  %v392_v16 = vld [vmem:[#allocation7 + $0x10] sm:$0xff] }
  0x65   :  { %979 = vmatmul.mubr.f32.vlgmr.msra.gmra.mxu0 %v131_v17  ;;  %1016 = vmatprep.subr.mxu0 %v1215_v0  ;;  %v391_v17 = vld [vmem:[#allocation7 + $0x8] sm:$0xff] }
  0x66   :  { %1048 = vmatprep.mubr.msk.f32.mxu0 %vm1216_vm0, %v1215_v0  ;;  %1010 = vmatpush3.msra.mxu1 %v262_v32 }
  0x67   :  { %1011 = vmatprep.subr.mxu1 %v1215_v0  ;;  %1017 = vmatpush3.msra.mxu0 %v405_v3  ;;  %v533_v3 = vld [vmem:[#allocation8 + $0x70] sm:$0xff] }
  0x68   :  { %1012 = vmatpush3.msra.mxu1 %v261_v33  ;;  %1018 = vmatprep.subr.mxu0 %v1215_v0 }
  0x69   :  { %1019 = vmatpush3.msra.mxu0 %v404_v4  ;;  %v532_v4 = vld [vmem:[#allocation8 + $0x68] sm:$0xff] }
  0x6a   :  { %1020 = vmatprep.subr.mxu0 %v1215_v0 }
  0x6b   :  { %1021 = vmatpush3.msra.mxu0 %v403_v5  ;;  %v531_v5 = vld [vmem:[#allocation8 + $0x60] sm:$0xff] }
  0x6c   :  { %1022 = vmatprep.subr.mxu0 %v1215_v0 }
  0x6d   :  { %1023 = vmatpush3.msra.mxu0 %v402_v6  ;;  %v530_v6 = vld [vmem:[#allocation8 + $0x58] sm:$0xff] }
  0x6e   :  { %1024 = vmatprep.subr.mxu0 %v1215_v0 }
  0x6f   :  { %1025 = vmatpush3.msra.mxu0 %v401_v7  ;;  %v529_v7 = vld [vmem:[#allocation8 + $0x50] sm:$0xff] }
  0x70   :  { %1026 = vmatprep.subr.mxu0 %v1215_v0 }
  0x71   :  { %1027 = vmatpush3.msra.mxu0 %v400_v8  ;;  %v528_v8 = vld [vmem:[#allocation8 + $0x48] sm:$0xff] }
  0x72   :  { %1028 = vmatprep.subr.mxu0 %v1215_v0 }
  0x73   :  { %1029 = vmatpush3.msra.mxu0 %v399_v9  ;;  %v527_v9 = vld [vmem:[#allocation8 + $0x40] sm:$0xff] }
  0x74   :  { %1030 = vmatprep.subr.mxu0 %v1215_v0 }
  0x75   :  { %1031 = vmatpush3.msra.mxu0 %v398_v10  ;;  %v526_v10 = vld [vmem:[#allocation8 + $0x38] sm:$0xff] }
  0x76   :  { %1032 = vmatprep.subr.mxu0 %v1215_v0 }
  0x77   :  { %1033 = vmatpush3.msra.mxu0 %v397_v11  ;;  %v525_v11 = vld [vmem:[#allocation8 + $0x30] sm:$0xff] }
  0x78   :  { %1034 = vmatprep.subr.mxu0 %v1215_v0 }
  0x79   :  { %1035 = vmatpush3.msra.mxu0 %v396_v12  ;;  %v524_v12 = vld [vmem:[#allocation8 + $0x28] sm:$0xff] }
  0x7a   :  { %1036 = vmatprep.subr.mxu0 %v1215_v0 }
  0x7b   :  { %1037 = vmatpush3.msra.mxu0 %v395_v13  ;;  %v523_v13 = vld [vmem:[#allocation8 + $0x20] sm:$0xff] }
  0x7c   :  { %1038 = vmatprep.subr.mxu0 %v1215_v0 }
  0x7d   :  { %1039 = vmatpush3.msra.mxu0 %v394_v14  ;;  %v522_v14 = vld [vmem:[#allocation8 + $0x18] sm:$0xff] }
  0x7e   :  { %1040 = vmatprep.subr.mxu0 %v1215_v0 }
  0x7f   :  { %1041 = vmatpush3.msra.mxu0 %v393_v15  ;;  %v521_v15 = vld [vmem:[#allocation8 + $0x10] sm:$0xff] }
  0x80   :  { %1042 = vmatprep.subr.mxu0 %v1215_v0 }
  0x81   :  { %1043 = vmatpush3.msra.mxu0 %v392_v16  ;;  %v520_v16 = vld [vmem:[#allocation8 + $0x8] sm:$0xff] }
  0x82   :  { %1044 = vmatprep.subr.mxu0 %v1215_v0 }
  0x83   :  { %1045 = vmatpush3.msra.mxu0 %v391_v17  ;;  %v519_v17 = vld [vmem:[#allocation8] sm:$0xff] }
  0x84   :  { %1046 = vmatprep.subr.mxu0 %v1215_v0 }
  0x85   :  { %1047 = vmatpush3.msra.mxu0 %v390_v18  ;;  %v856_v18 = vld [vmem:[%s1469_s10] ss:$0 sm:$0xff] }
 0x125   :  { %v221_v35 = vpop.f32.mrf.mxu0 }
 0x126   :  { %v222_v36 = vadd.f32 %v852_v34, %v221_v35 }
 0x127   :  { %v980_v37 = vpop.f32.mrf.mxu0 }
 0x128   :  { %v225_v38 = vrot.slane %v222_v36, 4 }
 0x12a   :  { %v226_v39 = vadd.f32 %v225_v38, %v222_v36 }
 0x12c   :  { %v227_v40 = vrot.slane %v226_v39, 2 }
 0x12e   :  { %v228_v41 = vadd.f32 %v227_v40, %v226_v39  ;;  %v370_v39 = vld [vmem:[%s1466_s7] sm:$0x1] }
 0x130   :  { %v229_v42 = vrot.slane %v228_v41, 1 }
 0x132   :  { %v230_v43 = vadd.f32 %v229_v42, %v228_v41 }
 0x134   :  { %v231_v44 = vmul.f32 0.125, %v230_v43  ;;  %v855_v43 = vld [vmem:[%s1467_s8] ss:$0 sm:$0xff] }
 0x136   :  { %v232_v45 = vsub.f32 %v222_v36, %v231_v44 }
 0x138   :  { %v233_v46 = vmul.f32 %v232_v45, %v232_v45 }
 0x13a   :  { %v234_v47 = vrot.slane %v233_v46, 4 }
 0x13c   :  { %v235_v48 = vadd.f32 %v234_v47, %v233_v46  ;;  %v550_v47 = vld [vmem:[#allocation8 + $0xf8] sm:$0xff] }
 0x13d   :  { %563 = vmatprep.subr.mxu1 %v550_v47  ;;  %v734_v47 = vld [vmem:[#allocation10 + $0x78] sm:$0xff] }
 0x13e   :  { %v236_v49 = vrot.slane %v235_v48, 2 }
 0x140   :  { %v237_v50 = vadd.f32 %v236_v49, %v235_v48  ;;  %v549_v48 = vld [vmem:[#allocation8 + $0xf0] sm:$0xff]  ;;  %v548_v49 = vld [vmem:[#allocation8 + $0xe8] sm:$0xff] }
 0x142   :  { %v238_v51 = vrot.slane %v237_v50, 1 }
 0x144   :  { %v239_v52 = vadd.f32 %v238_v51, %v237_v50  ;;  %v547_v50 = vld [vmem:[#allocation8 + $0xe0] sm:$0xff]  ;;  %v546_v51 = vld [vmem:[#allocation8 + $0xd8] sm:$0xff] }
 0x146   :  { %v240_v53 = vmul.f32 0.125, %v239_v52  ;;  %v545_v52 = vld [vmem:[#allocation8 + $0xd0] sm:$0xff] }
 0x148   :  { %v242_v54 = vadd.f32 1e-05, %v240_v53  ;;  %v544_v53 = vld [vmem:[#allocation8 + $0xc8] sm:$0xff] }
 0x14a   :  { %1064 = vrsqrt.f32 %v242_v54  ;;  %v543_v54 = vld [vmem:[#allocation8 + $0xc0] sm:$0xff] }
 0x157   :  { %v1065_v59 = vpop.eup %1064 }
 0x158   :  { %v244_v60 = vmul.f32 %v1065_v59, %v241_v57  ;;  %v541_v57 = vld [vmem:[#allocation8 + $0xb0] sm:$0xff]  ;;  %v540_v59 = vld [vmem:[#allocation8 + $0xa8] sm:$0xff] }
 0x15a   :  { %v249_v61 = vrot.slane %v244_v60, %v1397_v58  ;;  %v539_v60 = vld [vmem:[#allocation8 + $0xa0] sm:$0xff] }
 0x15c   :  { %v251_v63 = vmul.f32 %v249_v61, %v232_v45  ;;  %v538_v61 = vld [vmem:[#allocation8 + $0x98] sm:$0xff] }
 0x15e   :  { %v259_v1 = vadd.f32 %v853_v62, %v251_v63  ;;  %v537_v62 = vld [vmem:[#allocation8 + $0x90] sm:$0xff]  ;;  %v536_v63 = vld [vmem:[#allocation8 + $0x88] sm:$0xff] }
 0x160   :  { %v260_v2 = vmax.f32 %v259_v1, 0.0  ;;  %v535_v1 = vld [vmem:[#allocation8 + $0x80] sm:$0xff] }
 0x162   :  { %1014 = vmatmul.mubr.f32.vlgmr.msra.gmra.mxu1 %v260_v2  ;;  %v534_v2 = vld [vmem:[#allocation8 + $0x78] sm:$0xff] }
 0x163   :  { %627 = vmatprep.mubr.f32.mxu1 %v1215_v0  ;;  %564 = vmatpush1.msra.mxu1 %v549_v48  ;;  %v749_v48 = vld [vmem:[#allocation10 + $0xf0] sm:$0xff] }
 0x164   :  { %565 = vmatprep.subr.mxu1 %v548_v49  ;;  %v733_v49 = vld [vmem:[#allocation10 + $0x70] sm:$0xff] }
 0x165   :  { %566 = vmatpush1.msra.mxu1 %v547_v50  ;;  %v748_v50 = vld [vmem:[#allocation10 + $0xe8] sm:$0xff] }
 0x166   :  { %567 = vmatprep.subr.mxu1 %v546_v51  ;;  %v732_v51 = vld [vmem:[#allocation10 + $0x68] sm:$0xff] }
 0x167   :  { %568 = vmatpush1.msra.mxu1 %v545_v52  ;;  %v747_v52 = vld [vmem:[#allocation10 + $0xe0] sm:$0xff] }
 0x168   :  { %569 = vmatprep.subr.mxu1 %v544_v53  ;;  %v731_v53 = vld [vmem:[#allocation10 + $0x60] sm:$0xff] }
 0x169   :  { %570 = vmatpush1.msra.mxu1 %v543_v54  ;;  %v746_v54 = vld [vmem:[#allocation10 + $0xd8] sm:$0xff] }
 0x16a   :  { %571 = vmatprep.subr.mxu1 %v542_v55  ;;  %v730_v55 = vld [vmem:[#allocation10 + $0x58] sm:$0xff] }
 0x16b   :  { %572 = vmatpush1.msra.mxu1 %v541_v57  ;;  %v745_v57 = vld [vmem:[#allocation10 + $0xd0] sm:$0xff] }
 0x16c   :  { %573 = vmatprep.subr.mxu1 %v540_v59  ;;  %v729_v59 = vld [vmem:[#allocation10 + $0x50] sm:$0xff] }
 0x16d   :  { %574 = vmatpush1.msra.mxu1 %v539_v60  ;;  %v744_v60 = vld [vmem:[#allocation10 + $0xc8] sm:$0xff] }
 0x16e   :  { %575 = vmatprep.subr.mxu1 %v538_v61  ;;  %v728_v61 = vld [vmem:[#allocation10 + $0x48] sm:$0xff] }
 0x16f   :  { %576 = vmatpush1.msra.mxu1 %v537_v62  ;;  %v743_v62 = vld [vmem:[#allocation10 + $0xc0] sm:$0xff] }
 0x170   :  { %577 = vmatprep.subr.mxu1 %v536_v63  ;;  %v727_v63 = vld [vmem:[#allocation10 + $0x40] sm:$0xff] }
 0x171   :  { %578 = vmatpush1.msra.mxu1 %v535_v1  ;;  %v742_v1 = vld [vmem:[#allocation10 + $0xb8] sm:$0xff] }
 0x172   :  { %579 = vmatprep.subr.mxu1 %v534_v2  ;;  %v726_v2 = vld [vmem:[#allocation10 + $0x38] sm:$0xff] }
 0x173   :  { %580 = vmatpush1.msra.mxu1 %v533_v3  ;;  %v741_v3 = vld [vmem:[#allocation10 + $0xb0] sm:$0xff] }
 0x174   :  { %581 = vmatprep.subr.mxu1 %v532_v4  ;;  %v725_v4 = vld [vmem:[#allocation10 + $0x30] sm:$0xff] }
 0x175   :  { %582 = vmatpush1.msra.mxu1 %v531_v5  ;;  %v740_v5 = vld [vmem:[#allocation10 + $0xa8] sm:$0xff] }
 0x176   :  { %583 = vmatprep.subr.mxu1 %v530_v6  ;;  %v724_v6 = vld [vmem:[#allocation10 + $0x28] sm:$0xff] }
 0x177   :  { %584 = vmatpush1.msra.mxu1 %v529_v7  ;;  %v739_v7 = vld [vmem:[#allocation10 + $0xa0] sm:$0xff] }
 0x178   :  { %585 = vmatprep.subr.mxu1 %v528_v8  ;;  %v723_v8 = vld [vmem:[#allocation10 + $0x20] sm:$0xff] }
 0x179   :  { %586 = vmatpush1.msra.mxu1 %v527_v9  ;;  %v738_v9 = vld [vmem:[#allocation10 + $0x98] sm:$0xff] }
 0x17a   :  { %587 = vmatprep.subr.mxu1 %v526_v10  ;;  %v722_v10 = vld [vmem:[#allocation10 + $0x18] sm:$0xff] }
 0x17b   :  { %588 = vmatpush1.msra.mxu1 %v525_v11  ;;  %v737_v11 = vld [vmem:[#allocation10 + $0x90] sm:$0xff] }
 0x17c   :  { %589 = vmatprep.subr.mxu1 %v524_v12  ;;  %v721_v12 = vld [vmem:[#allocation10 + $0x10] sm:$0xff] }
 0x17d   :  { %590 = vmatpush1.msra.mxu1 %v523_v13  ;;  %v736_v13 = vld [vmem:[#allocation10 + $0x88] sm:$0xff] }
 0x17e   :  { %591 = vmatprep.subr.mxu1 %v522_v14  ;;  %v720_v14 = vld [vmem:[#allocation10 + $0x8] sm:$0xff] }
 0x17f   :  { %592 = vmatpush1.msra.mxu1 %v521_v15  ;;  %v735_v15 = vld [vmem:[#allocation10 + $0x80] sm:$0xff] }
 0x180   :  { %593 = vmatprep.subr.mxu1 %v520_v16  ;;  %v719_v16 = vld [vmem:[#allocation10] sm:$0xff] }
 0x181   :  { %594 = vmatpush1.msra.mxu1 %v519_v17  ;;  %v551_v17 = vld [vmem:[%s1473_s14] sm:$0x3] }
 0x222   :  { %v350_v20 = vpop.f32.mrf.mxu1 }
 0x223   :  { %v351_v21 = vadd.f32 %v854_v19, %v350_v20 }
 0x224   :  { %v1015_v22 = vpop.f32.mrf.mxu1 }
 0x225   :  { %v354_v23 = vrot.slane %v351_v21, 4 }
 0x227   :  { %v355_v24 = vadd.f32 %v354_v23, %v351_v21 }
 0x229   :  { %v356_v25 = vrot.slane %v355_v24, 2 }
 0x22b   :  { %v357_v26 = vadd.f32 %v356_v25, %v355_v24 }
 0x22d   :  { %v358_v27 = vrot.slane %v357_v26, 1 }
 0x22f   :  { %v359_v28 = vadd.f32 %v358_v27, %v357_v26 }
 0x231   :  { %v360_v29 = vmul.f32 0.125, %v359_v28 }
 0x233   :  { %v361_v30 = vsub.f32 %v351_v21, %v360_v29 }
 0x235   :  { %v362_v31 = vmul.f32 %v361_v30, %v361_v30 }
 0x237   :  { %v363_v32 = vrot.slane %v362_v31, 4 }
 0x239   :  { %v364_v33 = vadd.f32 %v363_v32, %v362_v31 }
 0x23b   :  { %v365_v0 = vrot.slane %v364_v33, 2 }
 0x23d   :  { %v366_v34 = vadd.f32 %v365_v0, %v364_v33 }
 0x23f   :  { %v367_v35 = vrot.slane %v366_v34, 1 }
 0x241   :  { %v368_v36 = vadd.f32 %v367_v35, %v366_v34 }
 0x243   :  { %v369_v37 = vmul.f32 0.125, %v368_v36 }
 0x245   :  { %v371_v38 = vadd.f32 1e-05, %v369_v37 }
 0x247   :  { %1066 = vrsqrt.f32 %v371_v38  ;;  %v499_v38 = vld [vmem:[%s1470_s11] sm:$0x1] }
 0x254   :  { %v1067_v40 = vpop.eup %1066 }
 0x255   :  { %v373_v41 = vmul.f32 %v1067_v40, %v370_v39 }
 0x257   :  { %v378_v42 = vrot.slane %v373_v41, %v1397_v58 }
 0x259   :  { %v380_v44 = vmul.f32 %v378_v42, %v361_v30  ;;  %v857_v42 = vld [vmem:[%s1471_s12] ss:$0 sm:$0xff] }
 0x25b   :  { %v388_v45 = vadd.f32 %v855_v43, %v380_v44 }
 0x25d   :  { %v389_v46 = vmax.f32 %v388_v45, 0.0 }
 0x25f   :  { %1049 = vmatmul.mubr.f32.vlgmr.msra.gmra.mxu0 %v389_v46  ;;  %v750_v46 = vld [vmem:[#allocation10 + $0xf8] sm:$0xff] }
 0x260   :  { %911 = vmatprep.subr.mxu0 %v750_v46 }
 0x261   :  { %912 = vmatpush3.msra.mxu0 %v734_v47 }
 0x262   :  { %913 = vmatprep.subr.mxu0 %v749_v48 }
 0x263   :  { %914 = vmatpush3.msra.mxu0 %v733_v49 }
 0x264   :  { %915 = vmatprep.subr.mxu0 %v748_v50 }
 0x265   :  { %916 = vmatpush3.msra.mxu0 %v732_v51 }
 0x266   :  { %917 = vmatprep.subr.mxu0 %v747_v52 }
 0x267   :  { %918 = vmatpush3.msra.mxu0 %v731_v53 }
 0x268   :  { %919 = vmatprep.subr.mxu0 %v746_v54 }
 0x269   :  { %920 = vmatpush3.msra.mxu0 %v730_v55 }
 0x26a   :  { %921 = vmatprep.subr.mxu0 %v745_v57 }
 0x26b   :  { %922 = vmatpush3.msra.mxu0 %v729_v59 }
 0x26c   :  { %923 = vmatprep.subr.mxu0 %v744_v60  ;;  %v1217_v60 = vmov 1966171168  }
 0x26d   :  { %924 = vmatpush3.msra.mxu0 %v728_v61  ;;  %v675_v61 = vunpack.c.l.s4 %v1217_v60 }
 0x26e   :  { %925 = vmatprep.subr.mxu0 %v743_v62 }
 0x26f   :  { %926 = vmatpush3.msra.mxu0 %v727_v63  ;;  %v676_v62 = vunpack.c.0.s8 %v675_v61 }
 0x270   :  { %927 = vmatprep.subr.mxu0 %v742_v1 }
 0x271   :  { %928 = vmatpush3.msra.mxu0 %v726_v2  ;;  %v679_v1 = vsub.s32 %v676_v62, %v1391_v56 }
 0x272   :  { %929 = vmatprep.subr.mxu0 %v741_v3 }
 0x273   :  { %930 = vmatpush3.msra.mxu0 %v725_v4 }
 0x274   :  { %931 = vmatprep.subr.mxu0 %v740_v5  ;;  %v666_v5 = vld [vmem:[%s1474_s15] sm:$0x3] }
 0x275   :  { %932 = vmatpush3.msra.mxu0 %v724_v6 }
 0x276   :  { %933 = vmatprep.subr.mxu0 %v739_v7  ;;  %v703_v7 = vld [vmem:[%s1475_s16] sm:$0x3]  ;;  %s1218_s16 = smov [#allocation11]  }
 0x277   :  { %934 = vmatpush3.msra.mxu0 %v723_v8  ;;  %s841_s2 = sshll.u32 %s1218_s16, 4  ;;  %s842_s2 = int_to_ptr.vmem [resolvable:$true] %s841_s2 }
 0x278   :  { %935 = vmatprep.subr.mxu0 %v738_v9  ;;  %s1178_s0 = scalar_lea.vmem %s842_s2, 128  ;;  %p1183_p12 = scmp.lt.s32.totalorder %s842_s2, %s842_s2 }
 0x279   :  { %936 = vmatpush3.msra.mxu0 %v722_v10  ;;  %v708_v10 = vrot.slane %v703_v7, %v1397_v58  ;;  %p1179_p11 = scmp.ne.s32.totalorder %s842_s2, %s1178_s0  ;;  %p1184_p13 = scmp.lt.s32.totalorder %s1178_s0, %s1178_s0 }
 0x27a   :  { %937 = vmatprep.subr.mxu0 %v737_v11 }
 0x27b   :  { %938 = vmatpush3.msra.mxu0 %v721_v12  ;;  %p1185_p0 = por %p1184_p13, %p1183_p12 }
 0x27c   :  { %939 = vmatprep.subr.mxu0 %v736_v13 }
 0x27d   :  { %940 = vmatpush3.msra.mxu0 %v720_v14  ;;  %p1186_p1 = pnand %p1185_p0, %p1179_p11 }
 0x27e   :  { %941 = vmatprep.subr.mxu0 %v735_v15 }
 0x27f   :  { %942 = vmatpush3.msra.mxu0 %v719_v16 }
 0x31f   :  { %v479_v19 = vpop.f32.mrf.mxu0 }
 0x320   :  { %v480_v20 = vadd.f32 %v856_v18, %v479_v19  ;;  %v559_v18 = vsub.s32 1, %v1391_v56  ;;  %v556_v19 = vrot.slane %v551_v17, %v1397_v58 }
 0x321   :  { %v1050_v21 = vpop.f32.mrf.mxu0 }
 0x322   :  { %v483_v22 = vrot.slane %v480_v20, 4  ;;  %v712_v11 = vrot.slane %v703_v7, %v559_v18 }
 0x324   :  { %v484_v23 = vadd.f32 %v483_v22, %v480_v20 }
 0x326   :  { %v485_v24 = vrot.slane %v484_v23, 2 }
 0x328   :  { %v486_v25 = vadd.f32 %v485_v24, %v484_v23 }
 0x32a   :  { %v487_v26 = vrot.slane %v486_v25, 1 }
 0x32c   :  { %v488_v27 = vadd.f32 %v487_v26, %v486_v25 }
 0x32e   :  { %v489_v28 = vmul.f32 0.125, %v488_v27 }
 0x330   :  { %v490_v29 = vsub.f32 %v480_v20, %v489_v28  ;;  %v560_v20 = vrot.slane %v551_v17, %v559_v18 }
 0x332   :  { %v491_v30 = vmul.f32 %v490_v29, %v490_v29 }
 0x334   :  { %v492_v31 = vrot.slane %v491_v30, 4 }
 0x336   :  { %v493_v32 = vadd.f32 %v492_v31, %v491_v30 }
 0x338   :  { %v494_v33 = vrot.slane %v493_v32, 2 }
 0x33a   :  { %v495_v0 = vadd.f32 %v494_v33, %v493_v32 }
 0x33c   :  { %v496_v34 = vrot.slane %v495_v0, 1 }
 0x33e   :  { %v497_v35 = vadd.f32 %v496_v34, %v495_v0 }
 0x340   :  { %v498_v36 = vmul.f32 0.125, %v497_v35 }
 0x342   :  { %v500_v37 = vadd.f32 1e-05, %v498_v36 }
 0x344   :  { %1068 = vrsqrt.f32 %v500_v37 }
 0x351   :  { %v1069_v39 = vpop.eup %1068 }
 0x352   :  { %v502_v40 = vmul.f32 %v1069_v39, %v499_v38 }
 0x354   :  { %v507_v41 = vrot.slane %v502_v40, %v1397_v58 }
 0x356   :  { %v509_v43 = vmul.f32 %v507_v41, %v490_v29 }
 0x358   :  { %v517_v44 = vadd.f32 %v857_v42, %v509_v43 }
 0x35a   :  { %v518_v45 = vmax.f32 %v517_v44, 0.0 }
 0x35c   :  { %628 = vmatmul.mubr.f32.vlgmr.msra.gmra.mxu1 %v518_v45 }
 0x41c   :  { %v629_v21 = vpop.f32.mrf.mxu1 }
 0x41d   :  { %v630_v22 = vadd.f32 %v629_v21, %v556_v19 }
 0x41e   :  { %v631_v23 = vpop.f32.mrf.mxu1 }
 0x41f   :  { %v634_v24 = vrot.slane %v630_v22, 4  ;;  %v632_v25 = vadd.f32 %v631_v23, %v560_v20  ;;  %v858_v20 = vld [vmem:[%s1477_s18] ss:$0 sm:$0xff] }
 0x421   :  { %v635_v26 = vadd.f32 %v634_v24, %v630_v22  ;;  %v640_v27 = vrot.slane %v632_v25, 4 }
 0x423   :  { %v636_v28 = vrot.slane %v635_v26, 2  ;;  %v641_v29 = vadd.f32 %v640_v27, %v632_v25 }
 0x425   :  { %v637_v30 = vadd.f32 %v636_v28, %v635_v26  ;;  %v642_v31 = vrot.slane %v641_v29, 2 }
 0x427   :  { %v638_v32 = vrot.slane %v637_v30, 1  ;;  %v643_v33 = vadd.f32 %v642_v31, %v641_v29 }
 0x429   :  { %v639_v0 = vadd.f32 %v638_v32, %v637_v30  ;;  %v644_v34 = vrot.slane %v643_v33, 1 }
 0x42b   :  { %v646_v35 = vmul.f32 0.125, %v639_v0  ;;  %v645_v36 = vadd.f32 %v644_v34, %v643_v33 }
 0x42d   :  { %v648_v37 = vsub.f32 %v630_v22, %v646_v35  ;;  %v647_v38 = vmul.f32 0.125, %v645_v36 }
 0x42f   :  { %v650_v39 = vmul.f32 %v648_v37, %v648_v37  ;;  %v649_v40 = vsub.f32 %v632_v25, %v647_v38 }
 0x431   :  { %v652_v41 = vrot.slane %v650_v39, 4  ;;  %v651_v42 = vmul.f32 %v649_v40, %v649_v40 }
 0x433   :  { %v653_v43 = vadd.f32 %v652_v41, %v650_v39  ;;  %v658_v44 = vrot.slane %v651_v42, 4 }
 0x435   :  { %v654_v45 = vrot.slane %v653_v43, 2  ;;  %v659_v46 = vadd.f32 %v658_v44, %v651_v42 }
 0x437   :  { %v655_v47 = vadd.f32 %v654_v45, %v653_v43  ;;  %v660_v48 = vrot.slane %v659_v46, 2 }
 0x439   :  { %v656_v49 = vrot.slane %v655_v47, 1  ;;  %v661_v50 = vadd.f32 %v660_v48, %v659_v46 }
 0x43b   :  { %v657_v51 = vadd.f32 %v656_v49, %v655_v47  ;;  %v662_v52 = vrot.slane %v661_v50, 1 }
 0x43d   :  { %v664_v53 = vmul.f32 0.125, %v657_v51  ;;  %v663_v54 = vadd.f32 %v662_v52, %v661_v50 }
 0x43f   :  { %v667_v55 = vadd.f32 1e-05, %v664_v53  ;;  %v665_v57 = vmul.f32 0.125, %v663_v54 }
 0x441   :  { %v668_v59 = vadd.f32 1e-05, %v665_v57  ;;  %1070 = vrsqrt.f32 %v667_v55 }
 0x443   :  { %1072 = vrsqrt.f32 %v668_v59 }
 0x44e   :  { %v1071_v63 = vpop.eup %1070 }
 0x450   :  { %v1073_v2 = vpop.eup %1072 }
 0x451   :  { %v673_v3 = vcombine.low %v1071_v63, %v1073_v2 }
 0x453   :  { %v680_v4 = vrot.slane %v673_v3, %v679_v1 }
 0x455   :  { %v687_v6 = vrot.slane %v680_v4, %v679_v1 }
 0x457   :  { %v689_v8 = vmul.f32 %v687_v6, %v666_v5 }
 0x459   :  { %v698_v9 = vrot.slane %v689_v8, %v559_v18  ;;  %v694_v12 = vrot.slane %v689_v8, %v1397_v58 }
 0x45b   :  { %v702_v56 = vmul.f32 %v698_v9, %v649_v40  ;;  %v701_v13 = vmul.f32 %v694_v12, %v648_v37 }
 0x45d   :  { %v716_v14 = vadd.f32 %v712_v11, %v702_v56  ;;  %v715_v15 = vadd.f32 %v708_v10, %v701_v13 }
 0x45f   :  { %v718_v16 = vmax.f32 %v716_v14, 0.0  ;;  %v717_v17 = vmax.f32 %v715_v15, 0.0 }
 0x461   :  { %822 = vmatprep.mubr.f32.mxu0 %v718_v16 }
 0x462   :  { %823 = vmatmul.mubr.f32.vlgmr.msra.gmra.mxu0 %v717_v17 }
 0x522   :  { %v943_v19 = vpop.f32.mrf.mxu0 }
 0x524   :  { %v944_v21 = vpop.f32.mrf.mxu0 }
 0x525   :  { %v945_v22 = vadd.f32 %v944_v21, %v943_v19 }
 0x527   :  { %v825_v23 = vadd.f32 %v945_v22, %v858_v20 }
 0x529   :  { %v859_v24 = vmul.f32 -1.442695, %v825_v23 }
 0x52b   :  { %1074 = vpow2.f32 %v859_v24 }
 0x538   :  { %v1075_v18 = vpop.eup %1074 }
 0x539   :  { %v831_v58 = vadd.f32 1.0, %v1075_v18 }
 0x53b   :  { %1076 = vrcp.f32 %v831_v58 }
 0x548   :  { %v1077_v25 = vpop.eup %1076 }
 0x549   :  { %834 = vst [vmem:[#allocation11] sm:$0xff] %v1077_v25 }
 0x54a   :  { %1189 = shalt.err (!%p1186_p1)
}
 0x54b   :  { %844 = dma.vmem_to_hbm [thread:$0]  %s842_s2, 128, %s1478_s19, [#allocation4]  }
 0x54c   :  { %1204 = dma.done.wait [#allocation4], 128  }
 0x54d   :  { %1205 = vsyncadd [#allocation4], 4294967168 }
 0x54e   :  { %848 = vsyncpa [#allocation3], 1 }
 0x54f   :  { %849 = vsyncpa [#allocation6], 1 }
 0x550   :  { %850 = vsyncpa [#allocation9], 1 }
 0x551   :  { %851 = vsyncpa [#allocation4], 1 }

</bundles_post_ra>
